<compile_context>
chip_gen: v7x
topology: tpu7x:2x2x1
jax: 0.10.0
libtpu: 0.0.40
codegen_flags: <defaults>
</compile_context>

<pallas_src>
import functools

import jax
import jax.numpy as jnp
from jax import lax
from jax.experimental import pallas as pl
from jax.experimental.pallas import tpu as pltpu


# ----------------------------------------------------------------------------
# Hardware-aware VMEM budgeting.
# ----------------------------------------------------------------------------
def _vmem_limit_bytes() -> int:
    """Scoped-VMEM limit with headroom, derived from the actual chip."""
    phys = 128 * 1024 * 1024  # v5e / v6e physical VMEM
    try:
        info = pltpu.get_tpu_info()
        phys = int(getattr(info, "vmem_capacity_bytes", phys) or phys)
    except Exception:  # not on TPU / API drift -> conservative default
        pass
    # ~25% headroom for compiler-internal scratch; caps at 96 MiB on
    # v5e/v6e (128 MiB physical) and lands at ~48 MiB on v7x (64 MiB).
    return max(16 * 1024 * 1024, min((phys * 3) // 4, 96 * 1024 * 1024))


def _channel_tile(c_extent: int, plane_bytes: int, budget_bytes: int) -> int:
    """cdiv-friendly channel tile: full extent if it fits, else a multiple of 8.

    Never collapses to 1-channel tiles for awkward channel counts (the old
    divisor-only tiler's perf cliff); tail channels are masked in-kernel.
    """
    cap = max(1, budget_bytes // max(1, plane_bytes))
    if cap >= c_extent:
        return c_extent
    tile = (cap // 8) * 8
    if tile == 0:
        tile = 8  # minimum sublane-friendly tile; vmem_limit has headroom
    return min(tile, c_extent)


# ----------------------------------------------------------------------------
# Pool helper (flattened-plane, separable k x k max-pool, 'same' -inf padding).
# ----------------------------------------------------------------------------
def _flat_pool_keep(heat, col, H, W, pad):
    """Returns keep = (hmax == heat) for a k x k stride-1 same-padded max-pool.

    heat: (1, H*W) float32, row-major flattened plane.
    col:  (1, H*W) int32, col[q] = q % W (precomputed outside the kernel).
    """
    HW = H * W
    neg_inf = jnp.float32(-jnp.inf)
    pos = lax.broadcasted_iota(jnp.int32, (1, HW), 1)

    # Vertical pass: neighbours at +-d rows == +-d*W in the flat index.
    rowmax = heat
    for d in range(1, pad + 1):
        s = (d * W) % HW
        down = pltpu.roll(heat, shift=(-s) % HW, axis=1)       # heat[q + d*W]
        down = jnp.where(pos + d * W < HW, down, neg_inf)
        up = pltpu.roll(heat, shift=s, axis=1)                 # heat[q - d*W]
        up = jnp.where(pos - d * W >= 0, up, neg_inf)
        rowmax = jnp.maximum(rowmax, jnp.maximum(up, down))

    # Horizontal pass: neighbours at +-d columns, masked at row boundaries.
    hmax = rowmax
    for d in range(1, pad + 1):
        right = pltpu.roll(rowmax, shift=(-d) % HW, axis=1)    # rowmax[q + d]
        right = jnp.where(col + d < W, right, neg_inf)
        left = pltpu.roll(rowmax, shift=d % HW, axis=1)        # rowmax[q - d]
        left = jnp.where(col - d >= 0, left, neg_inf)
        hmax = jnp.maximum(hmax, jnp.maximum(left, right))

    return hmax == heat


# ----------------------------------------------------------------------------
# Kernels.
# ----------------------------------------------------------------------------
def _fused_nms_kernel(col_ref, x_ref, o_ref, *, cp, H, W, pad):
    """Single pass per batch: channel max -> pool -> keep -> multiply."""
    # Reduce in the input dtype, cast only the (1, H*W) plane (max is exact).
    heat = jnp.max(x_ref[0, :cp, :], axis=0, keepdims=True).astype(jnp.float32)
    keep = _flat_pool_keep(heat, col_ref[...], H, W, pad)      # (1, HW) bool
    o_ref[0] = x_ref[0] * keep.astype(o_ref.dtype)


def _keep_mask_kernel(col_ref, x_ref, keep_ref, heat_acc, *, cp, H, W, pad):
    """Fallback stage 1: channel-tiled max reduction -> pooled keep mask."""
    ci = pl.program_id(1)
    cpt = x_ref.shape[1]

    @pl.when(ci == 0)
    def _init():
        heat_acc[...] = jnp.full(heat_acc.shape, -jnp.inf, heat_acc.dtype)

    x = x_ref[0]                                   # (cpt, H*W), input dtype
    if cp % cpt:                                   # tail / box channels: mask
        ch = lax.broadcasted_iota(jnp.int32, (cpt, 1), 0)
        x = jnp.where(ch < cp - ci * cpt, x, jnp.array(-jnp.inf, x.dtype))
    tile_max = jnp.max(x, axis=0, keepdims=True).astype(jnp.float32)
    heat_acc[...] = jnp.maximum(heat_acc[...], tile_max)

    @pl.when(ci == pl.num_programs(1) - 1)
    def _finalize():
        keep = _flat_pool_keep(heat_acc[...], col_ref[...], H, W, pad)
        keep_ref[0] = keep.astype(keep_ref.dtype)


def _apply_keep_kernel(x_ref, keep_ref, o_ref):
    """Fallback stage 2: out = points * keep (keep broadcasts over channels)."""
    o_ref[...] = x_ref[...] * keep_ref[...]


# ----------------------------------------------------------------------------
# Wrapper.
# ----------------------------------------------------------------------------
def points_nms(points: jax.Array, kernel_size: int = 3) -> jax.Array:
    """Pallas equivalent of PointsNonMaxSuppression.forward(points)."""
    B, C, H, W = points.shape
    assert C > 4, "module slices points[:, :-4]; needs >4 channels"
    assert jnp.issubdtype(points.dtype, jnp.floating), "floating dtype required"
    assert kernel_size >= 1 and kernel_size % 2 == 1, "odd kernel_size required"

    cp = C - 4
    pad = (kernel_size - 1) // 2
    HW = H * W
    itemsize = jnp.dtype(points.dtype).itemsize
    vmem_limit = _vmem_limit_bytes()

    # Lane-dense flat layout: last (lane) dim = H*W instead of W.
    x_flat = points.reshape(B, C, HW)
    # Precomputed column index (q % W) -- avoids integer mod inside the kernel.
    col = jnp.tile(jnp.arange(W, dtype=jnp.int32), H).reshape(1, HW)

    def cparams(sem):
        return pltpu.CompilerParams(dimension_semantics=sem,
                                    vmem_limit_bytes=vmem_limit)

    # ---- Fused single-pass path: minimum HBM traffic (1 read + 1 write). ----
    slab_bytes = C * HW * itemsize                 # one batch, one buffer
    fused_need = 4 * slab_bytes + 8 * HW * 4       # double-buffered io + planes
    if fused_need <= (vmem_limit * 9) // 10:
        out_flat = pl.pallas_call(
            functools.partial(_fused_nms_kernel, cp=cp, H=H, W=W, pad=pad),
            out_shape=jax.ShapeDtypeStruct((B, C, HW), points.dtype),
            grid=(B,),
            in_specs=[pl.BlockSpec((1, HW), lambda b: (0, 0)),
                      pl.BlockSpec((1, C, HW), lambda b: (b, 0, 0))],
            out_specs=pl.BlockSpec((1, C, HW), lambda b: (b, 0, 0)),
            compiler_params=cparams(("parallel",)),
        )(col, x_flat)
        # NOTE: on v7x (2 TensorCores) B >= 2 keeps both cores busy; a B == 1
        # workload would need a row-stripped fused variant (halo of `pad` rows)
        # to use the second core.
        return out_flat.reshape(B, C, H, W)

    # ---- Two-stage fallback for per-batch slabs that do not fit VMEM. ----
    tile = _channel_tile(C, HW * itemsize, vmem_limit // 6)

    # Stage 1: channel-tiled max reduction -> pooled keep mask (B, 1, H*W).
    keep = pl.pallas_call(
        functools.partial(_keep_mask_kernel, cp=cp, H=H, W=W, pad=pad),
        out_shape=jax.ShapeDtypeStruct((B, 1, HW), points.dtype),
        grid=(B, pl.cdiv(cp, tile)),
        in_specs=[pl.BlockSpec((1, HW), lambda b, c: (0, 0)),
                  pl.BlockSpec((1, tile, HW), lambda b, c: (b, c, 0))],
        out_specs=pl.BlockSpec((1, 1, HW), lambda b, c: (b, 0, 0)),
        scratch_shapes=[pltpu.VMEM((1, HW), jnp.float32)],
        compiler_params=cparams(("parallel", "arbitrary")),
    )(col, x_flat)

    # Stage 2: channel-tiled, lane-dense multiply.
    out_flat = pl.pallas_call(
        _apply_keep_kernel,
        out_shape=jax.ShapeDtypeStruct((B, C, HW), points.dtype),
        grid=(B, pl.cdiv(C, tile)),
        in_specs=[pl.BlockSpec((1, tile, HW), lambda b, c: (b, c, 0)),
                  pl.BlockSpec((1, 1, HW), lambda b, c: (b, 0, 0))],
        out_specs=pl.BlockSpec((1, tile, HW), lambda b, c: (b, c, 0)),
        compiler_params=cparams(("parallel", "parallel")),
    )(x_flat, keep)
    return out_flat.reshape(B, C, H, W)


# ----------------------------------------------------------------------------
# Pure-JAX reference (mirrors the PyTorch forward).
# ----------------------------------------------------------------------------
def points_nms_reference(points: jax.Array, kernel_size: int = 3) -> jax.Array:
    heat = jnp.max(points[:, :-4], axis=1, keepdims=True)
    pad = (kernel_size - 1) // 2
    B, _, H, W = heat.shape
    hp = jnp.pad(heat, ((0, 0), (0, 0), (pad, pad), (pad, pad)),
                 constant_values=-jnp.inf)
    windows = [hp[:, :, i:i + H, j:j + W]
               for i in range(kernel_size) for j in range(kernel_size)]
    hmax = jnp.stack(windows, axis=0).max(axis=0)
    keep = (hmax == heat).astype(points.dtype)
    return points * keep


if __name__ == "__main__":
    key = jax.random.PRNGKey(0)
    # 4 heatmap ("point") channels + 4 box channels, as implied by points[:, :-4].
    B, C, H, W = 2, 8, 16, 16
    points = jax.random.normal(key, (B, C, H, W), dtype=jnp.float32)

    nms = jax.jit(points_nms, static_argnames=("kernel_size",))
    out = jax.block_until_ready(nms(points, kernel_size=3))

    ref = points_nms_reference(points, kernel_size=3)
    assert out.shape == ref.shape and out.dtype == ref.dtype
    assert bool(jnp.allclose(out, ref)), "Pallas point-NMS mismatch vs reference"
    print("KERNEL_OK")
</pallas_src>

<mosaic_0001>
module attributes {stable_mosaic.version = 11 : i64} {
  func.func @_fused_nms_kernel(%arg0: i32, %arg1: memref<1x256xi32, #tpu.memory_space<vmem>>, %arg2: memref<1x8x256xf32, #tpu.memory_space<vmem>>, %arg3: memref<1x8x256xf32, #tpu.memory_space<vmem>>) attributes {dimension_semantics = [#tpu.dimension_semantics<parallel>], iteration_bounds = array<i64: 2>, scalar_prefetch = 0 : i64, scratch_operands = 0 : i64, tpu.core_type = #tpu.core_type<tc>, window_params = [{pipeline_mode = #tpu.pipeline_mode<synchronous>, transform_indices = @transform_0, window_bounds = array<i64: 1, 256>}, {transform_indices = @transform_1, window_bounds = array<i64: 1, 8, 256>}, {transform_indices = @transform_2, window_bounds = array<i64: 1, 8, 256>}]} {
    %c0 = arith.constant 0 : index
    %c0_0 = arith.constant 0 : index
    %c0_1 = arith.constant 0 : index
    %0 = vector.load %arg2[%c0, %c0_0, %c0_1] : memref<1x8x256xf32, #tpu.memory_space<vmem>>, vector<1x4x256xf32>
    %1 = vector.shape_cast %0 : vector<1x4x256xf32> to vector<4x256xf32>
    %cst = arith.constant dense<0xFF800000> : vector<256xf32>
    %2 = vector.multi_reduction <maximumf>, %1, %cst [0] : vector<4x256xf32> to vector<256xf32>
    %3 = vector.shape_cast %2 : vector<256xf32> to vector<1x256xf32>
    %c0_2 = arith.constant 0 : index
    %c0_3 = arith.constant 0 : index
    %4 = vector.load %arg1[%c0_2, %c0_3] : memref<1x256xi32, #tpu.memory_space<vmem>>, vector<1x256xi32>
    %5 = tpu.iota {dimensions = array<i32: 1>} : vector<1x256xi32>
    %c240_i32 = arith.constant 240 : i32
    %6 = tpu.dynamic_rotate %3 by %c240_i32 dim 1 : vector<1x256xf32>, i32 -> vector<1x256xf32>
    %c16_i32 = arith.constant 16 : i32
    %7 = vector.broadcast %c16_i32 : i32 to vector<1x256xi32>
    %8 = arith.addi %5, %7 : vector<1x256xi32>
    %c256_i32 = arith.constant 256 : i32
    %9 = vector.broadcast %c256_i32 : i32 to vector<1x256xi32>
    %10 = arith.cmpi slt, %8, %9 : vector<1x256xi32>
    %cst_4 = arith.constant 0xFF800000 : f32
    %11 = vector.broadcast %cst_4 : f32 to vector<1x256xf32>
    %12 = arith.select %10, %6, %11 : vector<1x256xi1>, vector<1x256xf32>
    %c16_i32_5 = arith.constant 16 : i32
    %13 = tpu.dynamic_rotate %3 by %c16_i32_5 dim 1 : vector<1x256xf32>, i32 -> vector<1x256xf32>
    %c16_i32_6 = arith.constant 16 : i32
    %14 = vector.broadcast %c16_i32_6 : i32 to vector<1x256xi32>
    %15 = arith.subi %5, %14 : vector<1x256xi32>
    %c0_i32 = arith.constant 0 : i32
    %16 = vector.broadcast %c0_i32 : i32 to vector<1x256xi32>
    %17 = arith.cmpi sge, %15, %16 : vector<1x256xi32>
    %cst_7 = arith.constant 0xFF800000 : f32
    %18 = vector.broadcast %cst_7 : f32 to vector<1x256xf32>
    %19 = arith.select %17, %13, %18 : vector<1x256xi1>, vector<1x256xf32>
    %20 = arith.maximumf %19, %12 : vector<1x256xf32>
    %21 = arith.maximumf %3, %20 : vector<1x256xf32>
    %c255_i32 = arith.constant 255 : i32
    %22 = tpu.dynamic_rotate %21 by %c255_i32 dim 1 : vector<1x256xf32>, i32 -> vector<1x256xf32>
    %c1_i32 = arith.constant 1 : i32
    %23 = vector.broadcast %c1_i32 : i32 to vector<1x256xi32>
    %24 = arith.addi %4, %23 : vector<1x256xi32>
    %c16_i32_8 = arith.constant 16 : i32
    %25 = vector.broadcast %c16_i32_8 : i32 to vector<1x256xi32>
    %26 = arith.cmpi slt, %24, %25 : vector<1x256xi32>
    %cst_9 = arith.constant 0xFF800000 : f32
    %27 = vector.broadcast %cst_9 : f32 to vector<1x256xf32>
    %28 = arith.select %26, %22, %27 : vector<1x256xi1>, vector<1x256xf32>
    %c1_i32_10 = arith.constant 1 : i32
    %29 = tpu.dynamic_rotate %21 by %c1_i32_10 dim 1 : vector<1x256xf32>, i32 -> vector<1x256xf32>
    %c1_i32_11 = arith.constant 1 : i32
    %30 = vector.broadcast %c1_i32_11 : i32 to vector<1x256xi32>
    %31 = arith.subi %4, %30 : vector<1x256xi32>
    %c0_i32_12 = arith.constant 0 : i32
    %32 = vector.broadcast %c0_i32_12 : i32 to vector<1x256xi32>
    %33 = arith.cmpi sge, %31, %32 : vector<1x256xi32>
    %cst_13 = arith.constant 0xFF800000 : f32
    %34 = vector.broadcast %cst_13 : f32 to vector<1x256xf32>
    %35 = arith.select %33, %29, %34 : vector<1x256xi1>, vector<1x256xf32>
    %36 = arith.maximumf %35, %28 : vector<1x256xf32>
    %37 = arith.maximumf %21, %36 : vector<1x256xf32>
    %38 = arith.cmpf oeq, %37, %3 : vector<1x256xf32>
    %c0_14 = arith.constant 0 : index
    %c0_15 = arith.constant 0 : index
    %c0_16 = arith.constant 0 : index
    %39 = vector.load %arg2[%c0_14, %c0_15, %c0_16] : memref<1x8x256xf32, #tpu.memory_space<vmem>>, vector<1x8x256xf32>
    %40 = vector.shape_cast %39 : vector<1x8x256xf32> to vector<8x256xf32>
    %41 = arith.extui %38 : vector<1x256xi1> to vector<1x256xi32>
    %42 = arith.sitofp %41 : vector<1x256xi32> to vector<1x256xf32>
    %43 = vector.broadcast %42 : vector<1x256xf32> to vector<8x256xf32>
    %44 = arith.mulf %40, %43 : vector<8x256xf32>
    %c0_17 = arith.constant 0 : index
    %c0_18 = arith.constant 0 : index
    %c0_19 = arith.constant 0 : index
    %45 = vector.load %arg3[%c0_17, %c0_18, %c0_19] : memref<1x8x256xf32, #tpu.memory_space<vmem>>, vector<1x8x256xf32>
    %46 = vector.shape_cast %45 : vector<1x8x256xf32> to vector<8x256xf32>
    %47 = vector.shape_cast %44 : vector<8x256xf32> to vector<1x8x256xf32>
    tpu.vector_store %arg3[%c0_17, %c0_18, %c0_19], %47 {strides = array<i32>} : memref<1x8x256xf32, #tpu.memory_space<vmem>>, vector<1x8x256xf32>,
    return
  }
  func.func @transform_0(%arg0: i32) -> (i32, i32) {
    %c0_i32 = arith.constant 0 : i32
    %c0_i32_0 = arith.constant 0 : i32
    %c0_i32_1 = arith.constant 0 : i32
    return %c0_i32, %c0_i32_0 : i32, i32
  }
  func.func @transform_1(%arg0: i32) -> (i32, i32, i32) {
    %c0_i32 = arith.constant 0 : i32
    %c0_i32_0 = arith.constant 0 : i32
    %c0_i32_1 = arith.constant 0 : i32
    return %arg0, %c0_i32, %c0_i32_0 : i32, i32, i32
  }
  func.func @transform_2(%arg0: i32) -> (i32, i32, i32) {
    %c0_i32 = arith.constant 0 : i32
    %c0_i32_0 = arith.constant 0 : i32
    %c0_i32_1 = arith.constant 0 : i32
    return %arg0, %c0_i32, %c0_i32_0 : i32, i32, i32
  }
}

</mosaic_0001>

<bundles_post_ra>
// kernel: tile.9
= control target key start
LH: loop header
LB: loop body
LE: loop exit
PB: predicated region body
PF: predicated region fallthrough
CT: control target
= control target key end

     0   :  { %s8_s6 = smov 3  ;;  %s22_s9 = smov 3  ;;  %s170_s0 = inlined_call_operand.vmem [shape: s32[16,16], index: 0, kind: input, shape index: {}]   ;;  %s171_s1 = inlined_call_operand.hbm [shape: s32[1,256], index: 1, kind: output, shape index: {}]  }
   0x1   :  { %v77_v0 = vld [vmem:[%s170_s0 + $0x7] ss:$8 sm:%s8_s6]   ;;  %s116_s10 = smov 112   ;;  %v79_v1 = vld [vmem:[%s170_s0 + $0x5] ss:$8 sm:%s22_s9]   ;;  %s15_s13 = smov 3 }
   0x2   :  { %10 = vrot.lane.b32.xlu0 %v77_v0, %s116_s10  ;;  %s117_s14 = smov 80   ;;  %v78_v2 = vld [vmem:[%s170_s0 + $0x6] ss:$8 sm:%s15_s13]   ;;  %s29_s17 = smov 3 }
   0x3   :  { %24 = vrot.lane.b32.xlu1 %v79_v1, %s117_s14 }
   0x4   :  { %2 = vsyncpa [#allocation1], 0  ;;  %v80_v3 = vld [vmem:[%s170_s0 + $0x4] ss:$8 sm:%s29_s17]   ;;  %s36_s20 = smov 3  ;;  %s43_s21 = smov 3 }
   0x5   :  { %s118_s22 = smov 96   ;;  %vm5_vm0 = vcmask 130048   ;;  %s119_s23 = smov 64   ;;  %v81_v4 = vld [vmem:[%s170_s0 + $0x3] ss:$8 sm:%s36_s20]   ;;  %vm12_vm1 = vcmask 1048448  }
   0x6   :  { %17 = vrot.lane.b32.xlu0 %v78_v2, %s118_s22  ;;  %s3_s26 = smov 3  ;;  %v82_v5 = vld [vmem:[%s170_s0 + $0x2] ss:$8 sm:%s43_s21]   ;;  %s50_s29 = smov 3  ;;  %vm19_vm2 = vcmask 917248   ;;  %vm26_vm3 = vcmask 786048  }
   0x7   :  { %31 = vrot.lane.b32.xlu1 %v80_v3, %s119_s23  ;;  %v4_v6 = vld [vmem:[%s170_s0] ss:$8 sm:%s3_s26]   ;;  %s120_s3 = smov 48   ;;  %s121_s4 = smov 32   ;;  %vm33_vm4 = vcmask 654848   ;;  %vm40_vm5 = vcmask 523648  }
   0x8   :  { %6 = vst.msk [vmem:[#allocation2] ss:$8 sm:$0x3] %vm5_vm0, %v4_v6   ;;  %v83_v7 = vld [vmem:[%s170_s0 + $0x1] ss:$8 sm:%s50_s29]   ;;  %s122_s0 = smov 16  }
   0x9   :  { %vm47_vm6 = vcmask 392448   ;;  %vm54_vm7 = vcmask 261248   ;;  %s123_s7 = smov [#allocation0]  }
   0xa   :  { %38 = vrot.lane.b32.xlu0 %v81_v4, %s120_s3  ;;  %s71_s8 = sshll.u32 %s123_s7, 4  ;;  %s72_s8 = int_to_ptr.vmem [resolvable:$true] %s71_s8 }
   0xb   :  { %45 = vrot.lane.b32.xlu1 %v82_v5, %s121_s4  ;;  %s92_s9 = scalar_lea.vmem %s72_s8, 32  ;;  %p97_p1 = scmp.lt.s32.totalorder %s72_s8, %s72_s8 }
   0xc   :  { %p93_p0 = scmp.ne.s32.totalorder %s72_s8, %s92_s9  ;;  %p98_p2 = scmp.lt.s32.totalorder %s92_s9, %s92_s9 }
   0xe   :  { %52 = vrot.lane.b32.xlu0 %v83_v7, %s122_s0  ;;  %p99_p3 = por %p98_p2, %p97_p1 }
  0x10   :  { %p100_p4 = pnand %p99_p3, %p93_p0 }
  0x74   :  { %v11_v8 = vpop.permute.xlu0 %10  }
  0x75   :  { %13 = vst.msk [vmem:[#allocation2] ss:$8 sm:$0x3] %vm12_vm1, %v11_v8   ;;  %v25_v9 = vpop.permute.xlu1 %24  }
  0x78   :  { %v18_v10 = vpop.permute.xlu0 %17  }
  0x79   :  { %20 = vst.msk [vmem:[#allocation2] ss:$8 sm:$0x3] %vm19_vm2, %v18_v10   ;;  %v32_v11 = vpop.permute.xlu1 %31  }
  0x7a   :  { %27 = vst.msk [vmem:[#allocation2] ss:$8 sm:$0x3] %vm26_vm3, %v25_v9  }
  0x7b   :  { %34 = vst.msk [vmem:[#allocation2] ss:$8 sm:$0x3] %vm33_vm4, %v32_v11  }
  0x7c   :  { %v39_v12 = vpop.permute.xlu0 %38  }
  0x7d   :  { %41 = vst.msk [vmem:[#allocation2] ss:$8 sm:$0x3] %vm40_vm5, %v39_v12   ;;  %v46_v13 = vpop.permute.xlu1 %45  }
  0x7e   :  { %48 = vst.msk [vmem:[#allocation2] ss:$8 sm:$0x3] %vm47_vm6, %v46_v13  }
  0x80   :  { %v53_v14 = vpop.permute.xlu0 %52  }
  0x81   :  { %55 = vst.msk [vmem:[#allocation2] ss:$8 sm:$0x3] %vm54_vm7, %v53_v14  }
  0x88   :  { %v59_v15 = vld [vmem:[#allocation2] sm:$0x1]  ;;  %v63_v16 = vld [vmem:[#allocation2 + $0x8] sm:$0x1] }
  0x89   :  { %61 = vst [vmem:[#allocation0] sm:$0x1] %v59_v15  ;;  %66 = vst [vmem:[#allocation0 + $0x1] sm:$0x1] %v63_v16 }
  0x8a   :  { %103 = shalt.err (!%p100_p4)
}
  0x8b   :  { %s104_s12 = scalar_lea.hbm %s171_s1, 32 }
  0x8c   :  { %p105_p5 = scmp.ne.s32.totalorder %s171_s1, %s104_s12  ;;  %p108_p6 = scmp.lt.u32.totalorder %s104_s12, %s171_s1 }
  0x8e   :  { %p110_p7 = pnand %p108_p6, %p105_p5 }
  0x90   :  { %113 = shalt.err (!%p110_p7)
}
  0x91   :  { %74 = dma.vmem_to_hbm [thread:$0]  %s72_s8, 32, %s171_s1, [#allocation1]  }
  0x92   :  { %114 = dma.done.wait [#allocation1], 32  }
  0x93   :  { %115 = vsyncadd [#allocation1], 4294967264 }
  0x94   :  { %76 = vsyncpa [#allocation1], 1 }

// kernel: points_nms.1
= control target key start
LH: loop header
LB: loop body
LE: loop exit
PB: predicated region body
PF: predicated region fallthrough
CT: control target
= control target key end

     0   :  { %7 = vsyncpa [#allocation3], 0  ;;  %s874_s0 = inlined_call_operand.hbm [shape: s32[1,256], index: 0, kind: input, shape index: {}]   ;;  %s875_s1 = inlined_call_operand.hbm [shape: f32[2,8,256], index: 1, kind: input, shape index: {}]   ;;  %s876_s2 = inlined_call_operand.hbm [shape: f32[2,8,256], index: 2, kind: output, shape index: {}]  }
   0x1   :  { %8 = vsyncpa [#allocation6], 0 }
   0x2   :  { %10 = vsyncpa [#allocation6 + $0x1], 0 }
   0x3   :  { %11 = vsyncpa [#allocation4], 0 }
   0x4   :  { %13 = vsyncpa [#allocation4 + $0x1], 0  ;;  %s651_s9 = smov 0   ;;  %s653_s10 = smov 0  }
   0x5   :  { %s655_s11 = smov 0   ;;  %s657_s12 = smov 0  }
   0x6 LB: > { %s672_s13 = sadd.s32 4294967295, %s625_s12   ;;  %s411_s14 = sadd.s32 4294967294, %s625_s12   ;;  %s625_s12 = sphi %s657_s12, %s900_s12   ;;  %s621_s11 = sphi %s655_s11, %s899_s11   ;;  %s617_s10 = sphi %s653_s10, %s898_s10   ;;  %s613_s9 = sphi %s651_s9, %s897_s9  }
   0x7   : > { %p60_p0 = scmp.ne.s32.totalorder %s617_s10, %s613_s9  ;;  %p877_p1 = scmp.eq.s32.totalorder %s672_s13, 0 }
   0x8   : > { %p90_p3 = scmp.eq.s32.totalorder %s411_s14, 1  ;;  %p412_p5 = scmp.ge.s32.totalorder %s625_s12, 1 }
   0x9   : > { %p681_p4 = por %p877_p1, %p60_p0  ;;  %p97_p7 = scmp.lt.s32.totalorder %s625_s12, 3 }
   0xa   : > { %p686_p6 = por %p90_p3, %p60_p0  ;;  %s627_s18 = smov [#allocation2]  }
   0xb   : > { %s880_s15 = scalar_select %p681_p4, 1, 0 }
   0xc   : > { %s881_s16 = scalar_select %p686_p6, 1, 0 }
   0xd   : > { %p691_p8 = pnand %p412_p5, %p97_p7  ;;  %s110_s19 = sshll.u32 %s627_s18, 4  ;;  %s111_s19 = int_to_ptr.vmem [resolvable:$true] %s110_s19 }
   0xe   : > { %s699_s20 = sadd.s32 1, %s625_s12   ;;  %s47_s24 = sadd.s32 1, %s621_s11 }
   0xf   : > { %s882_s17 = scalar_select %p691_p8, 1, 0 }
  0x10   : > { %p442_p10 = pneg %p691_p8  ;;  %s44_s22 = ssub.s32 %s625_s12, %s699_s20 }
  0x11   : > { %p709_p12 = scmp.eq.s32.totalorder %s44_s22, 0  ;;  %s497_s27 = scalar_lea.hbm %s874_s0, 32 }
  0x12   : > { %p703_p11 = pnand %p442_p10, %p877_p1  ;;  %p498_p0 = scmp.ne.s32.totalorder %s874_s0, %s497_s27 }
  0x13   : > { %s884_s23 = scalar_select %p709_p12, 1, 0 }
  0x14   : > { %p499_p3 = pneg %p703_p11  ;;  %p504_p10 = scmp.lt.u32.totalorder %s497_s27, %s874_s0 }
  0x16   : > { %p500_p5 = pnand %p499_p3, %p498_p0 }
  0x18   : > { %p501_p7 = pneg %p500_p5 }
  0x1a   : > { %p506_p9 = pnand %p504_p10, %p501_p7 }
  0x1c   : > { %509 = shalt.err (!%p506_p9)
}
  0x1d   : > { %s510_s4 = scalar_lea.vmem %s111_s19, 32  ;;  %p518_p6 = scmp.lt.s32.totalorder %s111_s19, %s111_s19 }
  0x1e   : > { %p511_p1 = scmp.ne.s32.totalorder %s111_s19, %s510_s4  ;;  %p519_p4 = scmp.lt.s32.totalorder %s510_s4, %s510_s4 }
  0x20   : > { %p513_p2 = pnand %p511_p1, %p499_p3  ;;  %p520_p8 = por %p519_p4, %p518_p6 }
  0x22   : > { %p514_p13 = pneg %p513_p2 }
  0x24   : > { %p521_p12 = pnand %p520_p8, %p514_p13 }
  0x26   : > { %524 = shalt.err (!%p521_p12)
}
  0x27   : > { %445 = dma.hbm_to_vmem [thread:$0]  (!%p703_p11), %s874_s0, 32, %s111_s19, [#allocation3]  }
  0x28   : > { %p885_p1 = scmp.ne.s32.totalorder %s884_s23, 0  ;;  %p55_p2 = scmp.eq.s32.totalorder %s625_s12, 0 }
  0x29   : > { %p886_p4 = scmp.ne.s32.totalorder %s621_s11, %s617_s10  ;;  %p887_p6 = scmp.eq.s32.totalorder %s672_s13, 1 }
  0x2a   : > { %s735_s7 = scalar_select %p885_p1, %s621_s11, %s47_s24  }
  0x2b   : > { %p743_p8 = por %p887_p6, %p886_p4  ;;  %p455_p9 = scmp.lt.s32.totalorder %s625_s12, 2 }
  0x2c   : > { %s121_s14 = sand.u32 1, %s621_s11   ;;  %p889_p12 = pmov %p886_p4 }
  0x2d   : > { %s415_s18 = sshll.u32 %s121_s14, 4  ;;  %s432_s21 = sshll.u32 %s625_s12, 8 }
  0x2e   : > { %p56_p13 = por %p55_p2, %p889_p12  ;;  %s756_s19 = scalar_lea.hbm %s875_s1, %s432_s21 }
  0x2f   : > { %s125_s23 = scalar_lea.vmem [#allocation5], %s415_s18  ;;  %s122_s27 = scalar_lea.sflag [#allocation6], %s121_s14 }
  0x30   : > { %s133_s24 = sshll.u32 %s125_s23, 4  ;;  %p758_p11 = pnand %p455_p9, %p56_p13  ;;  %s762_s24 = int_to_ptr.vmem [resolvable:$true] %s133_s24 }
  0x31   : > { %s525_s28 = scalar_lea.hbm %s756_s19, 256  ;;  %s530_s3 = scalar_lea.hbm %s875_s1, 512 }
  0x32   : > { %p526_p0 = scmp.ne.s32.totalorder %s756_s19, %s525_s28  ;;  %p527_p3 = pneg %p758_p11 }
  0x33   : > { %p531_p10 = scmp.lt.u32.totalorder %s756_s19, %s875_s1  ;;  %p532_p1 = scmp.lt.u32.totalorder %s530_s3, %s525_s28 }
  0x34   : > { %p528_p5 = pnand %p527_p3, %p526_p0  ;;  %p534_p4 = scmp.lt.u32.totalorder %s525_s28, %s756_s19 }
  0x35   : > { %p533_p2 = por %p532_p1, %p531_p10 }
  0x36   : > { %p529_p7 = pneg %p528_p5 }
  0x37   : > { %p535_p6 = por %p534_p4, %p533_p2 }
  0x39   : > { %p536_p9 = pnand %p535_p6, %p529_p7 }
  0x3b   : > { %539 = shalt.err (!%p536_p9)
}
  0x3c   : > { %s540_s6 = scalar_lea.vmem %s762_s24, 256  ;;  %s628_s14 = smov [#allocation5]  }
  0x3d   : > { %p541_p12 = scmp.ne.s32.totalorder %s762_s24, %s540_s6  ;;  %s545_s18 = sshll.u32 %s628_s14, 4  ;;  %s546_s18 = int_to_ptr.vmem [resolvable:$false] %s545_s18 }
  0x3e   : > { %s547_s21 = scalar_lea.vmem %s546_s18, 512  ;;  %p548_p5 = scmp.lt.s32.totalorder %s762_s24, %s546_s18 }
  0x3f   : > { %p543_p13 = pnand %p541_p12, %p527_p3  ;;  %p549_p10 = scmp.lt.s32.totalorder %s547_s21, %s540_s6 }
  0x41   : > { %p544_p0 = pneg %p543_p13  ;;  %p550_p1 = por %p549_p10, %p548_p5 }
  0x43   : > { %p551_p2 = pnand %p550_p1, %p544_p0 }
  0x45   : > { %554 = shalt.err (!%p551_p2)
}
  0x46   : > { %449 = dma.hbm_to_vmem [thread:$0]  (!%p758_p11), %s756_s19, 256, %s762_s24, %s122_s27  }
  0x47   : > { %p891_p7 = scmp.ne.s32.totalorder %s882_s17, 0 }
  0x48   : > { %p892_p3 = scmp.eq.s32.totalorder (!%p891_p7), %s672_s13, 0 }
  0x49   : > { %142 = sbr.rel (%p891_p7) target bundleno = 377 (0x179), region = 28 }
  0x50   : > { %600 = dma.done.wait (%p892_p3), [#allocation3], 32   ;;  %p893_p4 = pmov %p892_p3 }
  0x51   : > { %s796_s22 = sand.u32 1, %s617_s10   ;;  %p894_p11 = scmp.ne.s32.totalorder %s880_s15, 0 }
  0x52   : > { %602 = vsyncadd (%p893_p4), [#allocation3], 4294967264  ;;  %s420_s25 = sshll.u32 %s796_s22, 4  ;;  %s149_s23 = scalar_lea.sflag [#allocation6], %s796_s22 }
  0x53   : > { %s802_s19 = scalar_lea.vmem [#allocation5], %s420_s25 }
  0x54   : > { %604 = dma.done.wait (%p894_p11), %s149_s23, 256  }
  0x55   : > { %606 = vsyncadd (%p894_p11), %s149_s23, 4294967040  ;;  %vm175_vm0 = vcmask 1043456   ;;  %v173_v0 = vld [vmem:[%s802_s19] sm:$0xf]  ;;  %v174_v1 = vld [vmem:[%s802_s19 + $0x8] sm:$0xf]  ;;  %v191_v16 = vlaneseq }
  0x56   : > { %v176_v2 = vsel %vm175_vm0, %v173_v0, -inf  ;;  %v183_v3 = vsel %vm175_vm0, %v174_v1, -inf  ;;  %s629_s15 = smov 16   ;;  %s630_s17 = smov 112   ;;  %v633_v35 = vmov 1966171168  }
  0x57   : > { %v177_v4 = vrot.slane %v176_v2, 4  ;;  %v184_v5 = vrot.slane %v183_v3, 4  ;;  %v192_v17 = vand.u32 127, %v191_v16  ;;  %s631_s24 = smov 127   ;;  %s632_s26 = smov 1   ;;  %v237_v36 = vunpack.c.l.s4 %v633_v35 }
  0x58   : > { %v240_v38 = vshrl.u32 %v191_v16, 7  ;;  %v190_v44 = vld [vmem:[#allocation2] sm:$0x3]  ;;  %s433_s27 = sshll.u32 %s672_s13, 8  ;;  %s172_s28 = scalar_lea.vmem [#allocation7], %s420_s25 }
  0x59   : > { %v178_v6 = vmax.f32 %v176_v2, %v177_v4  ;;  %v185_v7 = vmax.f32 %v183_v3, %v184_v5  ;;  %v193_v18 = vadd.s32 128, %v192_v17  ;;  %v422_v19 = vadd.s32 4294967280, %v192_v17  ;;  %v296_v2 = vld [vmem:[%s802_s19] sm:$0xff]  ;;  %v297_v3 = vld [vmem:[%s802_s19 + $0x8] sm:$0xff]  ;;  %s329_s29 = sshll.u32 %s172_s28, 4  ;;  %s830_s4 = scalar_lea.hbm %s876_s2, %s433_s27  ;;  %s832_s29 = int_to_ptr.vmem [resolvable:$true] %s329_s29 }
  0x5a   : > { %vm211_vm1 = vcmp.lt.s32.totalorder %v192_v17, 16  ;;  %vm198_vm2 = vcmp.lt.s32.totalorder %v192_v17, 112  ;;  %v238_v37 = vunpack.c.0.s8 %v237_v36  ;;  %vm228_vm5 = vcmp.lt.s32.totalorder %v192_v17, 127  ;;  %s315_s13 = scalar_lea.sflag [#allocation4], %s796_s22  ;;  %s555_s5 = scalar_lea.vmem %s832_s29, 256 }
  0x5b   : > { %v179_v8 = vrot.slane %v178_v6, 2  ;;  %v186_v9 = vrot.slane %v185_v7, 2  ;;  %v202_v20 = vadd.s32 16, %v193_v18  ;;  %vm216_vm3 = vcmp.ge.s32.totalorder %v422_v19, 0  ;;  %p556_p6 = scmp.ne.s32.totalorder %s832_s29, %s555_s5  ;;  %s635_s6 = smov [#allocation7]  }
  0x5c   : > { %v241_v40 = vsub.s32 %v238_v37, %v240_v38  ;;  %vm256_vm6 = vcmp.lt.s32.totalorder %v192_v17, 1  ;;  %v231_v49 = vadd.s32 1, %v190_v44  ;;  %v424_v50 = vadd.s32 4294967295, %v190_v44  ;;  %s559_s14 = sshll.u32 %s635_s6, 4  ;;  %s560_s14 = int_to_ptr.vmem [resolvable:$false] %s559_s14 }
  0x5d   : > { %v180_v10 = vmax.f32 %v178_v6, %v179_v8  ;;  %v187_v11 = vmax.f32 %v185_v7, %v186_v9  ;;  %vm204_vm4 = vcmp.lt.s32.totalorder %v202_v20, 256  ;;  %v284_v57 = vsub.s32 0, %v240_v38  ;;  %p557_p9 = pnand %p556_p6, %p743_p8  ;;  %s561_s18 = scalar_lea.vmem %s560_s14, 512 }
  0x5e   : > { %vm232_vm7 = vcmp.lt.s32.totalorder %v231_v49, 16  ;;  %vm260_vm8 = vcmp.ge.s32.totalorder %v424_v50, 0  ;;  %v288_v58 = vsub.s32 1, %v240_v38  ;;  %v634_v4 = vmov 0.0   ;;  %p562_p13 = scmp.lt.s32.totalorder %s832_s29, %s560_s14  ;;  %p563_p0 = scmp.lt.s32.totalorder %s561_s18, %s555_s5 }
  0x5f   : > { %v181_v12 = vrot.slane %v180_v10, 1  ;;  %v188_v13 = vrot.slane %v187_v11, 1  ;;  %p558_p12 = pneg %p557_p9 }
  0x60   : > { %p564_p5 = por %p563_p0, %p562_p13 }
  0x61   : > { %v810_v14 = vmax.f32 %v180_v10, %v181_v12  ;;  %v814_v15 = vmax.f32 %v187_v11, %v188_v13 }
  0x62   : > { %p565_p10 = pnand %p564_p5, %p558_p12 }
  0x63   : > { %207 = vrot.lane.b32.xlu1 %v810_v14, %s629_s15  ;;  %194 = vrot.lane.b32.xlu0 %v810_v14, %s630_s17 }
  0x67   : > { %209 = vrot.lane.b32.xlu1 %v814_v15, %s629_s15  ;;  %196 = vrot.lane.b32.xlu0 %v814_v15, %s630_s17 }
  0xd5   : > { %v208_v21 = vpop.permute.xlu1 %207  ;;  %v195_v22 = vpop.permute.xlu0 %194 }
  0xd9   : > { %v210_v23 = vpop.permute.xlu1 %209  ;;  %v197_v24 = vpop.permute.xlu0 %196 }
  0xda   : > { %v212_v25 = vsel %vm211_vm1, %v208_v21, %v210_v23  ;;  %v213_v26 = vsel %vm211_vm1, %v210_v23, %v208_v21  ;;  %v199_v27 = vsel %vm198_vm2, %v195_v22, %v197_v24  ;;  %v200_v28 = vsel %vm198_vm2, %v197_v24, %v195_v22 }
  0xdb   : > { %v218_v29 = vsel %vm216_vm3, %v213_v26, -inf  ;;  %v206_v30 = vsel %vm204_vm4, %v200_v28, -inf }
  0xdc   : > { %v220_v31 = vmax.f32 %v218_v29, %v199_v27  ;;  %v221_v32 = vmax.f32 %v212_v25, %v206_v30 }
  0xde   : > { %v223_v33 = vmax.f32 %v814_v15, %v221_v32  ;;  %v222_v34 = vmax.f32 %v810_v14, %v220_v31 }
  0xe0   : > { %226 = vrot.lane.b32.xlu1 %v223_v33, %s631_s24  ;;  %224 = vrot.lane.b32.xlu0 %v222_v34, %s631_s24 }
  0xe4   : > { %254 = vrot.lane.b32.xlu1 %v223_v33, %s632_s26  ;;  %252 = vrot.lane.b32.xlu0 %v222_v34, %s632_s26 }
 0x152   : > { %v227_v39 = vpop.permute.xlu1 %226  ;;  %v225_v41 = vpop.permute.xlu0 %224 }
 0x153   : > { %v229_v42 = vsel %vm228_vm5, %v225_v41, %v227_v39  ;;  %v230_v43 = vsel %vm228_vm5, %v227_v39, %v225_v41 }
 0x154   : > { %v235_v45 = vcombine.low %v229_v42, %v230_v43 }
 0x156   : > { %v242_v46 = vrot.slane %v235_v45, %v241_v40  ;;  %v255_v47 = vpop.permute.xlu1 %254  ;;  %v253_v48 = vpop.permute.xlu0 %252 }
 0x157   : > { %v257_v51 = vsel %vm256_vm6, %v253_v48, %v255_v47  ;;  %v258_v52 = vsel %vm256_vm6, %v255_v47, %v253_v48 }
 0x158   : > { %v263_v53 = vcombine.low %v258_v52, %v257_v51  ;;  %v249_v54 = vrot.slane %v242_v46, %v241_v40 }
 0x15a   : > { %v270_v55 = vrot.slane %v263_v53, %v241_v40  ;;  %v251_v59 = vsel %vm232_vm7, %v249_v54, -inf }
 0x15c   : > { %v277_v56 = vrot.slane %v270_v55, %v241_v40 }
 0x15e   : > { %v279_v60 = vsel %vm260_vm8, %v277_v56, -inf }
 0x15f   : > { %v280_v61 = vmax.f32 %v279_v60, %v251_v59 }
 0x161   : > { %v285_v62 = vrot.slane %v280_v61, %v284_v57  ;;  %v289_v63 = vrot.slane %v280_v61, %v288_v58 }
 0x163   : > { %v292_v0 = vmax.f32 %v222_v34, %v285_v62  ;;  %v293_v1 = vmax.f32 %v223_v33, %v289_v63 }
 0x165   : > { %vm294_vm9 = vcmp.eq.f32.partialorder %v292_v0, %v810_v14  ;;  %vm295_vm10 = vcmp.eq.f32.partialorder %v293_v1, %v814_v15 }
 0x166   : > { %v425_v5 = vsel %vm294_vm9, 1.0, %v634_v4  ;;  %v426_v6 = vsel %vm295_vm10, 1.0, %v634_v4 }
 0x167   : > { %v305_v7 = vrot.slane %v425_v5, %v284_v57  ;;  %v309_v8 = vrot.slane %v426_v6, %v284_v57 }
 0x169   : > { %v310_v9 = vmul.f32 %v305_v7, %v296_v2  ;;  %v311_v10 = vmul.f32 %v309_v8, %v297_v3 }
 0x16b   : > { %312 = vst [vmem:[%s172_s28] sm:$0xff] %v310_v9  ;;  %313 = vst [vmem:[%s172_s28 + $0x8] sm:$0xff] %v311_v10 }
 0x16c   : > { %568 = shalt.err (!%p565_p10)
}
 0x16d   : > { %s569_s21 = scalar_lea.hbm %s830_s4, 256  ;;  %s573_s23 = scalar_lea.hbm %s876_s2, 512 }
 0x16e   : > { %p570_p1 = scmp.ne.s32.totalorder %s830_s4, %s569_s21  ;;  %p574_p3 = scmp.lt.u32.totalorder %s830_s4, %s876_s2 }
 0x16f   : > { %p575_p4 = scmp.lt.u32.totalorder %s573_s23, %s569_s21  ;;  %p577_p6 = scmp.lt.u32.totalorder %s569_s21, %s830_s4 }
 0x170   : > { %p571_p2 = pnand %p570_p1, %p743_p8 }
 0x171   : > { %p576_p11 = por %p575_p4, %p574_p3 }
 0x172   : > { %p572_p7 = pneg %p571_p2 }
 0x173   : > { %p578_p9 = por %p577_p6, %p576_p11 }
 0x175   : > { %p579_p12 = pnand %p578_p9, %p572_p7 }
 0x177   : > { %582 = shalt.err (!%p579_p12)
}
 0x178   : > { %440 = dma.vmem_to_hbm [thread:$0]  (%p743_p8), %s832_s29, 256, %s830_s4, %s315_s13  }
 0x179 PF: > { %s341_s17 = sand.u32 1, %s613_s9   ;;  %p895_p13 = scmp.ne.s32.totalorder %s881_s16, 0 }
 0x17a   : > { %p896_p0 = scmp.ge.s32.totalorder %s625_s12, 2  ;;  %s342_s24 = scalar_lea.sflag [#allocation4], %s341_s17 }
 0x17c   : > { %p451_p5 = pnand %p896_p0, %p895_p13 }
 0x17e   : > { %608 = dma.done.wait (!%p451_p5), %s342_s24, 256  }
 0x17f   : > { %610 = vsyncadd (!%p451_p5), %s342_s24, 4294967040  ;;  %p16_p10 = scmp.ge.s32.totalorder %s699_s20, 4   ;;  %s897_s9 = smov %s617_s10 }
 0x180   : > { %s898_s10 = smov %s621_s11  ;;  %s899_s11 = smov %s735_s7 }
 0x181   : > { %s900_s12 = smov %s699_s20  ;;  %18 = sbr.rel (!%p16_p10) target bundleno = 6 (0x6), region = 78 }
 0x188   :  { %347 = vsyncpa [#allocation3], 1 }
 0x189   :  { %349 = vsyncpa [#allocation3 + $0x1], 1 }
 0x18a   :  { %350 = vsyncpa [#allocation6], 1 }
 0x18b   :  { %352 = vsyncpa [#allocation6 + $0x1], 1 }
 0x18c   :  { %353 = vsyncpa [#allocation4], 1 }
 0x18d   :  { %355 = vsyncpa [#allocation4 + $0x1], 1 }

</bundles_post_ra>
